<compile_context>
chip_gen: v7x
topology: tpu7x:2x2x1
jax: 0.10.0
libtpu: 0.0.40
codegen_flags: <defaults>
</compile_context>

<pallas_src>
import jax
import jax.numpy as jnp
from jax.experimental import pallas as pl
from jax.experimental.pallas import tpu as pltpu


STATE_SPACE = 6
LANE = 128


# ---------------------------------------------------------------------------
# Path 1 (default): consume PyTorch-layout x (B, 6) directly.
# ---------------------------------------------------------------------------
def _policy_kernel_rows(x_ref, w_ref, o_ref):
    # x_ref: (R, 6) f32 VMEM -- block of batch rows, feature dim complete
    # w_ref: (1, 6) f32 VMEM -- the 6 weights (sublane-broadcast)
    # o_ref: (R, 1) f32 VMEM -- one output scalar per row
    s = jnp.sum(x_ref[...] * w_ref[...], axis=1, keepdims=True)  # VPU mul + XLU reduce
    o_ref[...] = jnp.maximum(s, 0.0)                             # fused ReLU


def policy_param_forward(x, w, *, rows_per_block=8192):
    """ReLU(x @ w): x (B, 6) f32, w (6,) f32 -> (B,) f32 (PyTorch-identical)."""
    B, S = x.shape
    assert S == STATE_SPACE
    x = x.astype(jnp.float32)
    w_row = jnp.asarray(w, jnp.float32).reshape(1, STATE_SPACE)

    if B <= rows_per_block:
        R = B                                   # single block == full array (always legal)
    else:
        R = max(8, (rows_per_block // 8) * 8)   # sublane-aligned row block
    num_blocks = pl.cdiv(B, R)                  # ragged final block masked by Pallas

    out = pl.pallas_call(
        _policy_kernel_rows,
        out_shape=jax.ShapeDtypeStruct((B, 1), jnp.float32),
        grid=(num_blocks,),
        in_specs=[
            pl.BlockSpec((R, STATE_SPACE), lambda i: (i, 0)),
            pl.BlockSpec((1, STATE_SPACE), lambda i: (0, 0)),   # weights, resident
        ],
        out_specs=pl.BlockSpec((R, 1), lambda i: (i, 0)),
        compiler_params=pltpu.CompilerParams(
            dimension_semantics=("parallel",),       # megacore row split on v7x
            vmem_limit_bytes=32 * 1024 * 1024,       # lane-padded blocks ~2 KiB/row buffered
        ),
        cost_estimate=pl.CostEstimate(
            flops=2 * B * STATE_SPACE + B,
            transcendentals=0,
            bytes_accessed=4 * (B * STATE_SPACE + STATE_SPACE + B),
        ),
    )(x, w_row)
    return out.reshape(B)                       # (B,1)->(B,) free bitcast


# ---------------------------------------------------------------------------
# Path 2 (preferred contract): producer supplies x feature-major as (6, B).
# Lane-dense end to end; near HBM roofline; no relayout passes anywhere.
# ---------------------------------------------------------------------------
def _policy_kernel_fm(x_ref, w_ref, o_ref):
    # x_ref: (6, R, 128) f32 VMEM -- batch on (sublane, lane)
    # w_ref: (6,)        f32 SMEM -- weights as scalars
    # o_ref: (R, 128)    f32 VMEM -- lane-dense output tile
    acc = x_ref[0] * w_ref[0]
    for k in range(1, STATE_SPACE):             # unrolled: 6 mul + 5 add on the VPU
        acc = acc + x_ref[k] * w_ref[k]
    o_ref[...] = jnp.maximum(acc, 0.0)


def policy_param_forward_feature_major(xt, w, *, rows128_per_block=1024):
    """xt: x already feature-major, shape (6, B) with B % 128 == 0."""
    S, B = xt.shape
    assert S == STATE_SPACE and B % LANE == 0
    rows = B // LANE
    xt = xt.astype(jnp.float32).reshape(STATE_SPACE, rows, LANE)   # free reshape
    w_vec = jnp.asarray(w, jnp.float32).reshape(STATE_SPACE)

    R = rows if rows <= rows128_per_block else max(8, (rows128_per_block // 8) * 8)
    num_blocks = pl.cdiv(rows, R)

    out = pl.pallas_call(
        _policy_kernel_fm,
        out_shape=jax.ShapeDtypeStruct((rows, LANE), jnp.float32),
        grid=(num_blocks,),
        in_specs=[
            pl.BlockSpec((STATE_SPACE, R, LANE), lambda i: (0, i, 0)),
            pl.BlockSpec(memory_space=pltpu.MemorySpace.SMEM),     # weights as SMEM scalars
        ],
        out_specs=pl.BlockSpec((R, LANE), lambda i: (i, 0)),
        compiler_params=pltpu.CompilerParams(
            dimension_semantics=("parallel",)),
        cost_estimate=pl.CostEstimate(
            flops=2 * B * STATE_SPACE + B,
            transcendentals=0,
            bytes_accessed=4 * (B * STATE_SPACE + STATE_SPACE + B),
        ),
    )(xt, w_vec)
    return out.reshape(B)                        # row-major keeps batch order


def init_policy_param(key):
    """Deterministic stand-in for torch.randn(6)/10 + 0.7 ."""
    return (jax.random.normal(key, (STATE_SPACE,), dtype=jnp.float32) / 10.0 + 0.7)


if __name__ == "__main__":
    key = jax.random.PRNGKey(0)
    k_w, k_x = jax.random.split(key)
    w = init_policy_param(k_w)

    # 1) Small batch, single block (the module's typical RL usage).
    x16 = jax.random.normal(k_x, (16, STATE_SPACE), dtype=jnp.float32)
    y16 = policy_param_forward(x16, w)
    jax.block_until_ready(y16)
    assert y16.shape == (16,)
    assert jnp.allclose(y16, jnp.maximum(x16 @ w, 0.0), atol=1e-5, rtol=1e-5)

    # 2) Multi-block grid (exercises the pipelined row tiling).
    x64 = jax.random.normal(jax.random.PRNGKey(1), (64, STATE_SPACE), dtype=jnp.float32)
    y64 = policy_param_forward(x64, w, rows_per_block=16)
    jax.block_until_ready(y64)
    assert jnp.allclose(y64, jnp.maximum(x64 @ w, 0.0), atol=1e-5, rtol=1e-5)

    # 3) Preferred feature-major contract (producer supplies x as (6, B)).
    x256 = jax.random.normal(jax.random.PRNGKey(2), (256, STATE_SPACE), dtype=jnp.float32)
    y256 = policy_param_forward_feature_major(x256.T, w)
    jax.block_until_ready(y256)
    assert jnp.allclose(y256, jnp.maximum(x256 @ w, 0.0), atol=1e-5, rtol=1e-5)

    print("KERNEL_OK")
</pallas_src>

<mosaic_0001>
module attributes {stable_mosaic.version = 11 : i64} {
  func.func @_policy_kernel_rows(%arg0: i32, %arg1: memref<16x6xf32, #tpu.memory_space<vmem>>, %arg2: memref<1x6xf32, #tpu.memory_space<vmem>>, %arg3: memref<16x1xf32, #tpu.memory_space<vmem>>) attributes {dimension_semantics = [#tpu.dimension_semantics<parallel>], iteration_bounds = array<i64: 1>, scalar_prefetch = 0 : i64, scratch_operands = 0 : i64, tpu.core_type = #tpu.core_type<tc>, window_params = [{transform_indices = @transform_0, window_bounds = array<i64: 16, 6>}, {pipeline_mode = #tpu.pipeline_mode<synchronous>, transform_indices = @transform_1, window_bounds = array<i64: 1, 6>}, {transform_indices = @transform_2, window_bounds = array<i64: 16, 1>}]} {
    %c0 = arith.constant 0 : index
    %c0_0 = arith.constant 0 : index
    %0 = vector.load %arg1[%c0, %c0_0] : memref<16x6xf32, #tpu.memory_space<vmem>>, vector<16x6xf32>
    %c0_1 = arith.constant 0 : index
    %c0_2 = arith.constant 0 : index
    %1 = vector.load %arg2[%c0_1, %c0_2] : memref<1x6xf32, #tpu.memory_space<vmem>>, vector<1x6xf32>
    %2 = vector.broadcast %1 : vector<1x6xf32> to vector<16x6xf32>
    %3 = arith.mulf %0, %2 : vector<16x6xf32>
    %cst = arith.constant dense<0.000000e+00> : vector<16xf32>
    %4 = vector.multi_reduction <add>, %3, %cst [1] : vector<16x6xf32> to vector<16xf32>
    %5 = vector.shape_cast %4 : vector<16xf32> to vector<16x1xf32>
    %cst_3 = arith.constant 0.000000e+00 : f32
    %6 = vector.broadcast %cst_3 : f32 to vector<16x1xf32>
    %7 = arith.maximumf %5, %6 : vector<16x1xf32>
    %c0_4 = arith.constant 0 : index
    %c0_5 = arith.constant 0 : index
    %8 = vector.load %arg3[%c0_4, %c0_5] : memref<16x1xf32, #tpu.memory_space<vmem>>, vector<16x1xf32>
    tpu.vector_store %arg3[%c0_4, %c0_5], %7 {strides = array<i32>} : memref<16x1xf32, #tpu.memory_space<vmem>>, vector<16x1xf32>,
    return
  }
  func.func @transform_0(%arg0: i32) -> (i32, i32) {
    %c0_i32 = arith.constant 0 : i32
    %c0_i32_0 = arith.constant 0 : i32
    return %arg0, %c0_i32 : i32, i32
  }
  func.func @transform_1(%arg0: i32) -> (i32, i32) {
    %c0_i32 = arith.constant 0 : i32
    %c0_i32_0 = arith.constant 0 : i32
    %c0_i32_1 = arith.constant 0 : i32
    return %c0_i32, %c0_i32_0 : i32, i32
  }
  func.func @transform_2(%arg0: i32) -> (i32, i32) {
    %c0_i32 = arith.constant 0 : i32
    %c0_i32_0 = arith.constant 0 : i32
    return %arg0, %c0_i32 : i32, i32
  }
}

</mosaic_0001>

<bundles_post_ra>
// kernel: tpu_custom_call.1
= control target key start
LH: loop header
LB: loop body
LE: loop exit
PB: predicated region body
PF: predicated region fallthrough
CT: control target
= control target key end

     0   :  { %vm22_vm0 = vcmask 48128   ;;  %vm31_vm1 = vcmask 7168   ;;  %s69_s0 = inlined_call_operand.vmem [shape: f32[16,6], index: 0, kind: input, shape index: {}]   ;;  %s70_s1 = inlined_call_operand.vmem [shape: f32[1,6], index: 1, kind: input, shape index: {}]   ;;  %s71_s2 = inlined_call_operand.vmem [shape: f32[16,1], index: 2, kind: output, shape index: {}]  }
   0x1   :  { %v11_v0 = vld [vmem:[%s69_s0] sm:$0xff]  ;;  %v12_v2 = vld [vmem:[%s69_s0 + $0x8] sm:$0xff] }
   0x2   :  { %v38_v1 = vld [vmem:[%s70_s1] ss:$0 sm:$0xff] }
   0x3   :  { %v20_v3 = vmul.f32 %v38_v1, %v11_v0  ;;  %v21_v4 = vmul.f32 %v38_v1, %v12_v2 }
   0x5   :  { %v23_v5 = vsel %vm22_vm0, %v20_v3, 0.0  ;;  %v26_v6 = vsel %vm22_vm0, %v21_v4, 0.0 }
   0x6   :  { %24 = vadd.xlane.f32.xlu0 %v23_v5 }
   0xa   :  { %27 = vadd.xlane.f32.xlu0 %v26_v6 }
  0x93   :  { %v25_v7 = vpop.xlane.xlu0 %24 }
  0x94   :  { %v29_v8 = vmax.f32 %v25_v7, 0.0 }
  0x96   :  { %32 = vst.msk [vmem:[%s71_s2] sm:$0xff] %vm31_vm1, %v29_v8 }
  0x97   :  { %v28_v9 = vpop.xlane.xlu0 %27 }
  0x98   :  { %v30_v10 = vmax.f32 %v28_v9, 0.0 }
  0x9a   :  { %33 = vst.msk [vmem:[%s71_s2 + $0x8] sm:$0xff] %vm31_vm1, %v30_v10 }

</bundles_post_ra>
